<compile_context>
chip_gen: v6e
topology: v6e:2x2x1
jax: 0.10.0
libtpu: 0.0.40
codegen_flags: <defaults>
</compile_context>

<pallas_src>
import functools

import jax
import jax.numpy as jnp
from jax.experimental import pallas as pl
from jax.experimental.pallas import tpu as pltpu


def _sigmoid_kernel(x_ref, o_ref, *, compute_dtype):
    x = x_ref[...].astype(compute_dtype)
    # sigmoid(x) = 0.5 * tanh(0.5 * x) + 0.5  -> one EUP op per element.
    y = jnp.tanh(x * 0.5) * 0.5 + 0.5
    o_ref[...] = y.astype(o_ref.dtype)


# Minimum sublane tile per dtype itemsize (f32 -> 8, bf16 -> 16, int8/fp8 -> 32).
_SUBLANE_MIN = {4: 8, 2: 16, 1: 32}
_LANE = 128
_MIN_GRID_STEPS = 4  # keep both v7x TensorCores busy on small/medium tensors


def _device_kind() -> str:
    try:
        return jax.devices()[0].device_kind.lower()
    except Exception:  # pragma: no cover - defensive; fall back to safe defaults
        return ""


def _sigmoid_2d(x2d: jax.Array, tr: int, compute_dtype) -> jax.Array:
    """Run the Pallas sigmoid over a lane-dense (rows, 128) slab."""
    rows, lane = x2d.shape
    grid = (pl.cdiv(rows, tr),)
    return pl.pallas_call(
        functools.partial(_sigmoid_kernel, compute_dtype=compute_dtype),
        out_shape=jax.ShapeDtypeStruct((rows, lane), x2d.dtype),
        grid_spec=pltpu.PrefetchScalarGridSpec(
            num_scalar_prefetch=0,
            grid=grid,
            in_specs=[pl.BlockSpec((tr, lane), lambda i: (i, 0))],
            out_specs=pl.BlockSpec((tr, lane), lambda i: (i, 0)),
        ),
        compiler_params=pltpu.CompilerParams(
            dimension_semantics=("parallel",),
        ),
    )(x2d)


def sigmoid_pallas(x: jax.Array, *, target_block_bytes: int | None = None) -> jax.Array:
    """Elementwise sigmoid over an arbitrary-shaped array via a Pallas TPU kernel."""
    orig_shape = x.shape
    dtype = x.dtype
    n = x.size
    if n == 0:
        return x

    kind = _device_kind()
    is_v7 = ("v7" in kind) or ("7x" in kind)
    is_v5 = "v5" in kind

    if target_block_bytes is None:
        # v7x: ~3.2 TB/s HBM -> bigger blocks to amortize per-step overhead.
        # v5e/v6e: 2 MiB already sits at ~85%+ of roofline.
        target_block_bytes = (6 if is_v7 else 2) * 1024 * 1024

    itemsize = jnp.dtype(dtype).itemsize
    sub_min = _SUBLANE_MIN.get(itemsize, 8)
    chunk = _LANE * sub_min  # minimum legal 2-D tile in elements

    # v5e has no bf16 VPU/EUP -> upcast narrow dtypes there; elsewhere compute
    # natively (halves vreg pressure / vld-vst traffic for packed dtypes).
    if itemsize >= 4 or is_v5:
        compute_dtype = jnp.float32
    else:
        compute_dtype = dtype

    def pick_tr(rows: int) -> int:
        tr = (target_block_bytes // (_LANE * itemsize)) // sub_min * sub_min
        tr = max(sub_min, min(tr, rows))
        # Guarantee >= _MIN_GRID_STEPS grid steps when the array is big enough,
        # so the "parallel" grid axis shards across both v7x TensorCores.
        if rows >= _MIN_GRID_STEPS * sub_min and pl.cdiv(rows, tr) < _MIN_GRID_STEPS:
            tr = max(sub_min, (rows // _MIN_GRID_STEPS) // sub_min * sub_min)
        return tr

    n_bulk = (n // chunk) * chunk

    if n_bulk == n:
        # Fast path: free reshape, no extra HBM passes.
        x2d = x.reshape(n // _LANE, _LANE)
        out2d = _sigmoid_2d(x2d, pick_tr(x2d.shape[0]), compute_dtype)
        return out2d.reshape(orig_shape)

    if n_bulk == 0:
        # Tiny ragged tensor (< one minimum tile): plain XLA sigmoid is cheaper
        # than padding to a full tile.
        return jax.nn.sigmoid(x)

    # Ragged path: Pallas over the chunk-aligned bulk, XLA over the small tail.
    # Avoids the old full-array pad + slice (two extra HBM passes).
    flat = x.reshape(-1)
    bulk2d = flat[:n_bulk].reshape(n_bulk // _LANE, _LANE)
    bulk_out = _sigmoid_2d(bulk2d, pick_tr(bulk2d.shape[0]), compute_dtype).reshape(-1)
    tail_out = jax.nn.sigmoid(flat[n_bulk:])
    return jnp.concatenate([bulk_out, tail_out]).reshape(orig_shape)


if __name__ == "__main__":
    key = jax.random.PRNGKey(0)

    # Small NCHW input consistent with a typical activation-module test.
    # size = 2*4*16*16 = 2048 -> exercises the aligned fast path.
    x = jax.random.normal(key, (2, 4, 16, 16), dtype=jnp.float32)
    out = sigmoid_pallas(x)
    jax.block_until_ready(out)
    ref = jax.nn.sigmoid(x)
    assert out.shape == x.shape and out.dtype == x.dtype
    assert jnp.allclose(out, ref, atol=1e-6, rtol=1e-6)

    # Ragged size (3*5*7*11 = 1155) -> exercises the bulk + tail path.
    x2 = jax.random.normal(jax.random.PRNGKey(1), (3, 5, 7, 11), dtype=jnp.float32)
    out2 = sigmoid_pallas(x2)
    jax.block_until_ready(out2)
    ref2 = jax.nn.sigmoid(x2)
    assert out2.shape == x2.shape and out2.dtype == x2.dtype
    assert jnp.allclose(out2, ref2, atol=1e-6, rtol=1e-6)

    # bf16 input -> exercises the native low-precision compute path.
    x3 = jax.random.normal(jax.random.PRNGKey(2), (4, 8, 32), dtype=jnp.bfloat16)
    out3 = sigmoid_pallas(x3)
    jax.block_until_ready(out3)
    ref3 = jax.nn.sigmoid(x3)
    assert out3.shape == x3.shape and out3.dtype == x3.dtype
    assert jnp.allclose(out3.astype(jnp.float32), ref3.astype(jnp.float32),
                        atol=2e-2, rtol=2e-2)

    print("KERNEL_OK")
</pallas_src>

<mosaic_0001>
module attributes {stable_mosaic.version = 11 : i64} {
  func.func @_sigmoid_kernel(%arg0: i32, %arg1: memref<16x128xf32, #tpu.memory_space<vmem>>, %arg2: memref<16x128xf32, #tpu.memory_space<vmem>>) attributes {dimension_semantics = [#tpu.dimension_semantics<parallel>], iteration_bounds = array<i64: 1>, scalar_prefetch = 0 : i64, scratch_operands = 0 : i64, tpu.core_type = #tpu.core_type<tc>, window_params = [{transform_indices = @transform_0, window_bounds = array<i64: 16, 128>}, {transform_indices = @transform_1, window_bounds = array<i64: 16, 128>}]} {
    %c0 = arith.constant 0 : index
    %c0_0 = arith.constant 0 : index
    %0 = vector.load %arg1[%c0, %c0_0] : memref<16x128xf32, #tpu.memory_space<vmem>>, vector<16x128xf32>
    %cst = arith.constant 5.000000e-01 : f32
    %1 = vector.broadcast %cst : f32 to vector<16x128xf32>
    %2 = arith.mulf %0, %1 : vector<16x128xf32>
    %3 = math.tanh %2 : vector<16x128xf32>
    %cst_1 = arith.constant 5.000000e-01 : f32
    %4 = vector.broadcast %cst_1 : f32 to vector<16x128xf32>
    %5 = arith.mulf %3, %4 : vector<16x128xf32>
    %cst_2 = arith.constant 5.000000e-01 : f32
    %6 = vector.broadcast %cst_2 : f32 to vector<16x128xf32>
    %7 = arith.addf %5, %6 : vector<16x128xf32>
    %c0_3 = arith.constant 0 : index
    %c0_4 = arith.constant 0 : index
    %8 = vector.load %arg2[%c0_3, %c0_4] : memref<16x128xf32, #tpu.memory_space<vmem>>, vector<16x128xf32>
    tpu.vector_store %arg2[%c0_3, %c0_4], %7 {strides = array<i32>} : memref<16x128xf32, #tpu.memory_space<vmem>>, vector<16x128xf32>,
    return
  }
  func.func @transform_0(%arg0: i32) -> (i32, i32) {
    %c0_i32 = arith.constant 0 : i32
    %c0_i32_0 = arith.constant 0 : i32
    return %arg0, %c0_i32 : i32, i32
  }
  func.func @transform_1(%arg0: i32) -> (i32, i32) {
    %c0_i32 = arith.constant 0 : i32
    %c0_i32_0 = arith.constant 0 : i32
    return %arg0, %c0_i32 : i32, i32
  }
}

</mosaic_0001>

<bundles_post_ra>
// kernel: tpu_custom_call.1
= control target key start
LH: loop header
LB: loop body
LE: loop exit
PB: predicated region body
PF: predicated region fallthrough
CT: control target
= control target key end

     0   :  { %6 = vsyncpa [#allocation3], 0  ;;  %s130_s0 = inlined_call_operand.hbm [shape: f32[16,128], index: 0, kind: input, shape index: {}]   ;;  %s131_s1 = inlined_call_operand.hbm [shape: f32[16,128], index: 1, kind: output, shape index: {}]  }
   0x1   :  { %7 = vsyncpa [#allocation4], 0  ;;  %s104_s6 = smov [#allocation2]  }
   0x2   :  { %s13_s7 = sshll.u32 %s104_s6, 4  ;;  %s14_s7 = int_to_ptr.vmem [resolvable:$true] %s13_s7 }
   0x3   :  { %s68_s8 = scalar_lea.vmem %s14_s7, 256  ;;  %p73_p1 = scmp.lt.s32.totalorder %s14_s7, %s14_s7 }
   0x4   :  { %p69_p0 = scmp.ne.s32.totalorder %s14_s7, %s68_s8  ;;  %p74_p2 = scmp.lt.s32.totalorder %s68_s8, %s68_s8 }
   0x6   :  { %p75_p3 = por %p74_p2, %p73_p1 }
   0x8   :  { %p76_p4 = pnand %p75_p3, %p69_p0 }
   0xa   :  { %79 = shalt.err (!%p76_p4)
}
   0xb   :  { %s105_s9 = smov 128   ;;  %s106_s10 = smov 8  }
   0xc   :  { %19 = dma.hbm_to_vmem [thread:$0]  %s130_s0, 256, %s14_s7, [#allocation3], %s105_s9, %s105_s9, %s106_s10  }
   0xd   :  { %100 = dma.done.wait [#allocation3], 256  }
   0xe   :  { %101 = vsyncadd [#allocation3], 4294967040  ;;  %v23_v0 = vld [vmem:[#allocation2] sm:$0xff]  ;;  %v24_v1 = vld [vmem:[#allocation2 + $0x8] sm:$0xff]  ;;  %s107_s13 = smov [#allocation5]  }
   0xf   :  { %v25_v2 = vmul.f32 0.5, %v23_v0  ;;  %v26_v3 = vmul.f32 0.5, %v24_v1  ;;  %s40_s14 = sshll.u32 %s107_s13, 4  ;;  %s41_s14 = int_to_ptr.vmem [resolvable:$true] %s40_s14 }
  0x10   :  { %s80_s0 = scalar_lea.vmem %s41_s14, 256  ;;  %p85_p6 = scmp.lt.s32.totalorder %s41_s14, %s41_s14 }
  0x11   :  { %56 = vtanh.f32 %v25_v2  ;;  %p81_p5 = scmp.ne.s32.totalorder %s41_s14, %s80_s0  ;;  %p86_p7 = scmp.lt.s32.totalorder %s80_s0, %s80_s0 }
  0x12   :  { %58 = vtanh.f32 %v26_v3 }
  0x13   :  { %p87_p8 = por %p86_p7, %p85_p6 }
  0x15   :  { %p88_p9 = pnand %p87_p8, %p81_p5 }
  0x1e   :  { %v57_v4 = vpop.eup %56 }
  0x1f   :  { %v59_v5 = vpop.eup %58  ;;  %v29_v6 = vmul.f32 0.5, %v57_v4 }
  0x20   :  { %v30_v7 = vmul.f32 0.5, %v59_v5 }
  0x21   :  { %v31_v8 = vadd.f32 0.5, %v29_v6 }
  0x22   :  { %v32_v9 = vadd.f32 0.5, %v30_v7 }
  0x23   :  { %33 = vst [vmem:[#allocation5] sm:$0xff] %v31_v8 }
  0x24   :  { %34 = vst [vmem:[#allocation5 + $0x8] sm:$0xff] %v32_v9 }
  0x25   :  { %91 = shalt.err (!%p88_p9)
}
  0x26   :  { %46 = dma.vmem_to_hbm [thread:$0]  %s41_s14, 256, %s131_s1, [#allocation4], %s105_s9, %s105_s9, %s106_s10  }
  0x27   :  { %102 = dma.done.wait [#allocation4], 256  }
  0x28   :  { %103 = vsyncadd [#allocation4], 4294967040 }
  0x29   :  { %50 = vsyncpa [#allocation3], 1 }
  0x2a   :  { %51 = vsyncpa [#allocation4], 1 }

</bundles_post_ra>
